<compile_context>
chip_gen: v6e
topology: v6e:2x2x1
jax: 0.10.0
libtpu: 0.0.40
codegen_flags: <defaults>
</compile_context>

<pallas_src>
import functools

import jax
import jax.numpy as jnp
from jax.experimental import pallas as pl
from jax.experimental.pallas import tpu as pltpu

LANES = 128                       # TPU lane width
GRAN = 16                         # sublane granularity for tiles (bf16-safe)
VMEM_BUDGET = 40 * 1024 * 1024    # blocks + intermediates target (fits v7x 64 MiB)


def _round_up(x, m):
    return (x + m - 1) // m * m


def _cdiv(a, b):
    return -(-a // b)


def _block_diag(w, reps):
    """(k, n) -> (reps*k, reps*n) block-diagonal with `w` on the diagonal."""
    k, n = w.shape
    eye = jnp.eye(reps, dtype=w.dtype)
    return jnp.einsum("ij,kn->ikjn", eye, w).reshape(reps * k, reps * n)


def _critic_kernel(x_ref, w_ref, b_ref, o_ref, *, lanes, out_w):
    # obs arrives in its HBM dtype (f32); cast to bf16 in-register for the MXU.
    x = x_ref[...].astype(jnp.bfloat16)               # (tile_p, lanes)
    w1 = w_ref[:, 0:lanes]                            # (lanes, lanes) bf16 block-diag
    w2 = w_ref[:, lanes:2 * lanes]                    # (lanes, lanes) bf16 block-diag
    w3 = w_ref[:, 2 * lanes:3 * lanes]                # (lanes, lanes) bf16, zero-padded
    b1 = b_ref[0:1, :]                                # (1, lanes) f32 (tiled)
    b2 = b_ref[1:2, :]                                # (1, lanes) f32 (tiled)
    b3 = b_ref[2:3, 0:out_w]                          # (1, out_w) f32 (tiled)

    # critic: Linear + ReLU   (f32 accumulation, activation math in f32)
    h = jnp.dot(x, w1, preferred_element_type=jnp.float32)
    h = jnp.maximum(h + b1, 0.0)
    # output[0:2]: Linear + ReLU
    h = jnp.dot(h.astype(jnp.bfloat16), w2, preferred_element_type=jnp.float32)
    h = jnp.maximum(h + b2, 0.0)
    # output[2:4]: Linear + Identity (full 128-wide MXU matmul, then slice)
    v = jnp.dot(h.astype(jnp.bfloat16), w3, preferred_element_type=jnp.float32)
    o_ref[...] = (v[:, 0:out_w] + b3).astype(o_ref.dtype)


def pack_episodic_critic_params(params):
    """Pack PyTorch-convention params into resident kernel slabs (run ONCE)."""
    w1, b1, w2, b2, w3, b3 = params
    H, F = w1.shape
    O = w3.shape[0]
    assert w2.shape == (H, H) and w3.shape == (O, H)
    assert H == F and LANES % F == 0, "packing assumes sizes[0]==sizes[1] and 128 % width == 0"
    pack = LANES // F
    out_w = pack * O
    assert out_w <= LANES

    w1_bd = _block_diag(w1.T.astype(jnp.float32), pack)            # (128, 128)
    w2_bd = _block_diag(w2.T.astype(jnp.float32), pack)            # (128, 128)
    w3_bd = _block_diag(w3.T.astype(jnp.float32), pack)            # (128, out_w)
    w3_pad = jnp.zeros((LANES, LANES), jnp.float32).at[:, :out_w].set(w3_bd)
    wslab = jnp.concatenate([w1_bd, w2_bd, w3_pad], axis=1).astype(jnp.bfloat16)

    bslab = jnp.zeros((8, LANES), jnp.float32)
    bslab = bslab.at[0, :].set(jnp.tile(b1.astype(jnp.float32), pack))
    bslab = bslab.at[1, :].set(jnp.tile(b2.astype(jnp.float32), pack))
    bslab = bslab.at[2, :out_w].set(jnp.tile(b3.astype(jnp.float32), pack))
    return wslab, bslab, F, O


def _choose_tile_p(P, max_tile_rows, pack):
    """Pick the packed-row tile: large enough to amortize ~0.35us/step overhead,
    >=2 grid steps for large batches (v7x megacore), and clamped so double-
    buffered in/out blocks + in-kernel intermediates fit the VMEM budget."""
    max_tile_p = max(GRAN, _round_up(max(1, max_tile_rows // pack), GRAN))
    tile_p = min(max_tile_p, max(GRAN, _round_up(_cdiv(P, 2), GRAN)))

    def vmem_bytes(tp):
        in_blk = tp * LANES * 4                  # f32 input block
        out_blk = tp * LANES * 4                 # output block (lane-padded to 128)
        interm = tp * LANES * 16                 # f32/bf16 intermediates (estimate)
        slabs = LANES * 3 * LANES * 2 + 8 * LANES * 4
        return 2 * (in_blk + out_blk) + interm + 2 * slabs

    while vmem_bytes(tile_p) > VMEM_BUDGET and tile_p > GRAN:
        tile_p = max(GRAN, _round_up(tile_p // 2, GRAN))
    return tile_p, vmem_bytes(tile_p)


@functools.partial(jax.jit, static_argnames=("feat", "out_dim", "max_tile_rows"))
def _episodic_critic_forward(obs, wslab, bslab, *, feat, out_dim, max_tile_rows):
    B, F = obs.shape
    assert F == feat
    pack = LANES // F
    out_w = pack * out_dim

    # Only a ragged batch (B % pack != 0) needs padding; the grid itself relies
    # on Pallas partial boundary blocks, so there is no big pad/copy pre-pass.
    B_pad = _round_up(B, pack)
    if B_pad != B:
        obs = jnp.pad(obs, ((0, B_pad - B), (0, 0)))
    P = B_pad // pack
    x = obs.reshape(P, LANES)                    # free row-major reshape, stays f32

    tile_p, vmem_need = _choose_tile_p(P, max_tile_rows, pack)
    grid = (_cdiv(P, tile_p),)
    vmem_limit = max(16 * 1024 * 1024,
                     min(56 * 1024 * 1024, vmem_need + 8 * 1024 * 1024))

    slab_bytes = (wslab.size * wslab.dtype.itemsize
                  + bslab.size * bslab.dtype.itemsize)
    cost = pl.CostEstimate(
        flops=2 * P * LANES * (2 * LANES + out_w),
        transcendentals=0,
        bytes_accessed=P * LANES * x.dtype.itemsize + P * out_w * 4 + slab_bytes,
    )

    out = pl.pallas_call(
        functools.partial(_critic_kernel, lanes=LANES, out_w=out_w),
        out_shape=jax.ShapeDtypeStruct((P, out_w), jnp.float32),
        grid=grid,
        in_specs=[
            pl.BlockSpec((tile_p, LANES), lambda i: (i, 0)),      # obs (streamed)
            pl.BlockSpec((LANES, 3 * LANES), lambda i: (0, 0)),   # weight slab (resident)
            pl.BlockSpec((8, LANES), lambda i: (0, 0)),           # bias slab (resident)
        ],
        out_specs=pl.BlockSpec((tile_p, out_w), lambda i: (i, 0)),
        compiler_params=pltpu.CompilerParams(
            dimension_semantics=("parallel",),
            vmem_limit_bytes=int(vmem_limit),
        ),
        cost_estimate=cost,
    )(x, wslab, bslab)

    # Row-major order of (P, pack*O) is already batch order -> free unpack.
    return out.reshape(B_pad, out_dim)[:B]


class EpisodicCriticPallas:
    """EpisodicCritic.forward (use_graph_feature=False).  Packs the weight/bias
    slabs once at construction; __call__ only runs the Pallas kernel."""
    # TODO(synk): use_graph_feature=True branch (Identity critic over a graph
    # feature) is not implemented; only the use_graph_feature=False MLP path is.

    def __init__(self, params, max_tile_rows=65536):
        (self.wslab, self.bslab,
         self.feat, self.out_dim) = pack_episodic_critic_params(params)
        self.max_tile_rows = int(max_tile_rows)

    def __call__(self, obs):
        return _episodic_critic_forward(
            obs, self.wslab, self.bslab,
            feat=self.feat, out_dim=self.out_dim,
            max_tile_rows=self.max_tile_rows)


def init_params(key, sizes):
    """Deterministic synthetic init matching EpisodicCritic layer shapes
    (PyTorch convention: W (out, in), b (out,))."""
    assert len(sizes) == 3, "script configured for sizes=[in, hidden, out]"
    f_in, hid, f_out = sizes
    ks = jax.random.split(key, 6)
    s = 0.1
    w1 = s * jax.random.normal(ks[0], (hid, f_in), jnp.float32)   # critic Linear
    b1 = s * jax.random.normal(ks[1], (hid,), jnp.float32)
    w2 = s * jax.random.normal(ks[2], (hid, hid), jnp.float32)    # output Linear #1
    b2 = s * jax.random.normal(ks[3], (hid,), jnp.float32)
    w3 = s * jax.random.normal(ks[4], (f_out, hid), jnp.float32)  # output Linear #2
    b3 = s * jax.random.normal(ks[5], (f_out,), jnp.float32)
    return (w1, b1, w2, b2, w3, b3)


def _reference(obs, params):
    w1, b1, w2, b2, w3, b3 = params
    h = jnp.maximum(obs @ w1.T + b1, 0.0)
    h = jnp.maximum(h @ w2.T + b2, 0.0)
    return h @ w3.T + b3


if __name__ == "__main__":
    sizes = [32, 32, 1]   # [obs_dim, hidden, value_dim]
    key = jax.random.PRNGKey(0)
    k_par, k_obs1, k_obs2 = jax.random.split(key, 3)

    params = init_params(k_par, sizes)
    critic = EpisodicCriticPallas(params)                 # slabs packed once

    # Test 1: tiny ragged batch (B % 4 != 0) -> pack padding + partial block.
    B1 = 37
    obs1 = jax.random.normal(k_obs1, (B1, sizes[0]), jnp.float32)
    out1 = jax.block_until_ready(critic(obs1))
    ref1 = _reference(obs1, params)
    assert out1.shape == (B1, sizes[-1])
    # bf16 matmul inputs => loosened tolerance vs. the f32 reference.
    assert jnp.allclose(out1, ref1, atol=5e-2, rtol=5e-2), \
        float(jnp.max(jnp.abs(out1 - ref1)))

    # Test 2: small tile ceiling -> multi-step "parallel" grid with a partial
    # boundary block on the last step (exercises the pipelined path).
    critic_small = EpisodicCriticPallas(params, max_tile_rows=64)
    B2 = 300
    obs2 = jax.random.normal(k_obs2, (B2, sizes[0]), jnp.float32)
    out2 = jax.block_until_ready(critic_small(obs2))
    ref2 = _reference(obs2, params)
    assert out2.shape == (B2, sizes[-1])
    assert jnp.allclose(out2, ref2, atol=5e-2, rtol=5e-2), \
        float(jnp.max(jnp.abs(out2 - ref2)))

    print("KERNEL_OK")
</pallas_src>

<mosaic_0001>
module attributes {stable_mosaic.version = 11 : i64} {
  func.func @_critic_kernel(%arg0: i32, %arg1: memref<16x128xf32, #tpu.memory_space<vmem>>, %arg2: memref<128x384xbf16, #tpu.memory_space<vmem>>, %arg3: memref<8x128xf32, #tpu.memory_space<vmem>>, %arg4: memref<16x4xf32, #tpu.memory_space<vmem>>) attributes {dimension_semantics = [#tpu.dimension_semantics<parallel>], iteration_bounds = array<i64: 1>, scalar_prefetch = 0 : i64, scratch_operands = 0 : i64, tpu.core_type = #tpu.core_type<tc>, window_params = [{transform_indices = @transform_0, window_bounds = array<i64: 16, 128>}, {pipeline_mode = #tpu.pipeline_mode<synchronous>, transform_indices = @transform_1, window_bounds = array<i64: 128, 384>}, {pipeline_mode = #tpu.pipeline_mode<synchronous>, transform_indices = @transform_2, window_bounds = array<i64: 8, 128>}, {transform_indices = @transform_3, window_bounds = array<i64: 16, 4>}]} {
    %c0 = arith.constant 0 : index
    %c0_0 = arith.constant 0 : index
    %0 = vector.load %arg1[%c0, %c0_0] : memref<16x128xf32, #tpu.memory_space<vmem>>, vector<16x128xf32>
    %1 = arith.truncf %0 : vector<16x128xf32> to vector<16x128xbf16>
    %c0_1 = arith.constant 0 : index
    %c0_2 = arith.constant 0 : index
    %2 = vector.load %arg2[%c0_1, %c0_2] : memref<128x384xbf16, #tpu.memory_space<vmem>>, vector<128x128xbf16>
    %c0_3 = arith.constant 0 : index
    %c128 = arith.constant 128 : index
    %3 = vector.load %arg2[%c0_3, %c128] : memref<128x384xbf16, #tpu.memory_space<vmem>>, vector<128x128xbf16>
    %c0_4 = arith.constant 0 : index
    %c256 = arith.constant 256 : index
    %4 = vector.load %arg2[%c0_4, %c256] : memref<128x384xbf16, #tpu.memory_space<vmem>>, vector<128x128xbf16>
    %c0_5 = arith.constant 0 : index
    %c0_6 = arith.constant 0 : index
    %5 = vector.load %arg3[%c0_5, %c0_6] : memref<8x128xf32, #tpu.memory_space<vmem>>, vector<1x128xf32>
    %c1 = arith.constant 1 : index
    %c0_7 = arith.constant 0 : index
    %6 = vector.load %arg3[%c1, %c0_7] : memref<8x128xf32, #tpu.memory_space<vmem>>, vector<1x128xf32>
    %c2 = arith.constant 2 : index
    %c0_8 = arith.constant 0 : index
    %7 = vector.load %arg3[%c2, %c0_8] : memref<8x128xf32, #tpu.memory_space<vmem>>, vector<1x4xf32>
    %cst = arith.constant dense<0.000000e+00> : vector<16x128xf32>
    %8 = tpu.matmul %1, %2, %cst {dimension_numbers = #tpu.dot_dimension_numbers<[1], [0], [0], [1], [0, 0, 1, 1], [], []>} : vector<16x128xbf16>, vector<128x128xbf16>, vector<16x128xf32> -> vector<16x128xf32>
    %9 = vector.broadcast %5 : vector<1x128xf32> to vector<16x128xf32>
    %10 = arith.addf %8, %9 : vector<16x128xf32>
    %cst_9 = arith.constant 0.000000e+00 : f32
    %11 = vector.broadcast %cst_9 : f32 to vector<16x128xf32>
    %12 = arith.maximumf %10, %11 : vector<16x128xf32>
    %13 = arith.truncf %12 : vector<16x128xf32> to vector<16x128xbf16>
    %cst_10 = arith.constant dense<0.000000e+00> : vector<16x128xf32>
    %14 = tpu.matmul %13, %3, %cst_10 {dimension_numbers = #tpu.dot_dimension_numbers<[1], [0], [0], [1], [0, 0, 1, 1], [], []>} : vector<16x128xbf16>, vector<128x128xbf16>, vector<16x128xf32> -> vector<16x128xf32>
    %15 = vector.broadcast %6 : vector<1x128xf32> to vector<16x128xf32>
    %16 = arith.addf %14, %15 : vector<16x128xf32>
    %cst_11 = arith.constant 0.000000e+00 : f32
    %17 = vector.broadcast %cst_11 : f32 to vector<16x128xf32>
    %18 = arith.maximumf %16, %17 : vector<16x128xf32>
    %19 = arith.truncf %18 : vector<16x128xf32> to vector<16x128xbf16>
    %cst_12 = arith.constant dense<0.000000e+00> : vector<16x128xf32>
    %20 = tpu.matmul %19, %4, %cst_12 {dimension_numbers = #tpu.dot_dimension_numbers<[1], [0], [0], [1], [0, 0, 1, 1], [], []>} : vector<16x128xbf16>, vector<128x128xbf16>, vector<16x128xf32> -> vector<16x128xf32>
    %21 = vector.extract_strided_slice %20 {offsets = [0, 0], sizes = [16, 4], strides = [1, 1]} : vector<16x128xf32> to vector<16x4xf32>
    %22 = vector.broadcast %7 : vector<1x4xf32> to vector<16x4xf32>
    %23 = arith.addf %21, %22 : vector<16x4xf32>
    %c0_13 = arith.constant 0 : index
    %c0_14 = arith.constant 0 : index
    %24 = vector.load %arg4[%c0_13, %c0_14] : memref<16x4xf32, #tpu.memory_space<vmem>>, vector<16x4xf32>
    tpu.vector_store %arg4[%c0_13, %c0_14], %23 {strides = array<i32>} : memref<16x4xf32, #tpu.memory_space<vmem>>, vector<16x4xf32>,
    return
  }
  func.func @transform_0(%arg0: i32) -> (i32, i32) {
    %c0_i32 = arith.constant 0 : i32
    %c0_i32_0 = arith.constant 0 : i32
    return %arg0, %c0_i32 : i32, i32
  }
  func.func @transform_1(%arg0: i32) -> (i32, i32) {
    %c0_i32 = arith.constant 0 : i32
    %c0_i32_0 = arith.constant 0 : i32
    %c0_i32_1 = arith.constant 0 : i32
    return %c0_i32, %c0_i32_0 : i32, i32
  }
  func.func @transform_2(%arg0: i32) -> (i32, i32) {
    %c0_i32 = arith.constant 0 : i32
    %c0_i32_0 = arith.constant 0 : i32
    %c0_i32_1 = arith.constant 0 : i32
    return %c0_i32, %c0_i32_0 : i32, i32
  }
  func.func @transform_3(%arg0: i32) -> (i32, i32) {
    %c0_i32 = arith.constant 0 : i32
    %c0_i32_0 = arith.constant 0 : i32
    return %arg0, %c0_i32 : i32, i32
  }
}

</mosaic_0001>

<bundles_post_ra>
// kernel: _episodic_critic_forward.1
= control target key start
LH: loop header
LB: loop body
LE: loop exit
PB: predicated region body
PF: predicated region fallthrough
CT: control target
= control target key end

     0   :  { %v503_v0 = vmov 0.0   ;;  %vm504_vm0 = vmmov 0   ;;  %vm356_vm1 = vcmask 31744   ;;  %s648_s1 = inlined_call_operand.vmem [shape: bf16[128,384], index: 1, kind: input, shape index: {}]   ;;  %s649_s0 = inlined_call_operand.vmem [shape: f32[10,128], index: 0, kind: input, shape index: {}]   ;;  %s650_s2 = inlined_call_operand.vmem [shape: f32[8,128], index: 2, kind: input, shape index: {}]   ;;  %s651_s3 = inlined_call_operand.vmem [shape: f32[10,4], index: 3, kind: output, shape index: {}]  }
   0x1   :  { %417 = vmatprep.subr.bf16.mxu0 %v503_v0  ;;  %v479_v1 = vld [vmem:[%s648_s1 + $0xa8] ss:$12 sps:$4 sm:$0xff]   ;;  %433 = vmatprep.mubr.msk.bf16.mxu0 %vm504_vm0, %v503_v0  ;;  %v480_v2 = vld [vmem:[%s648_s1 + $0x90] ss:$12 sps:$4 sm:$0xff]   ;;  %v481_v3 = vld [vmem:[%s648_s1 + $0x78] ss:$12 sps:$4 sm:$0xff]  }
   0x2   :  { %437 = vmatprep.subr.bf16.mxu1 %v503_v0  ;;  %453 = vmatprep.mubr.msk.bf16.mxu1 %vm504_vm0, %v503_v0  ;;  %v487_v4 = vld [vmem:[%s648_s1 + $0xac] ss:$12 sps:$4 sm:$0xff]   ;;  %v488_v6 = vld [vmem:[%s648_s1 + $0x94] ss:$12 sps:$4 sm:$0xff]   ;;  %v489_v8 = vld [vmem:[%s648_s1 + $0x7c] ss:$12 sps:$4 sm:$0xff]  }
   0x3   :  { %418 = vmatpush3.bf16.msra.mxu0 %v479_v1  ;;  %v482_v5 = vld [vmem:[%s648_s1 + $0x60] ss:$12 sps:$4 sm:$0xff]   ;;  %438 = vmatpush3.bf16.msra.mxu1 %v487_v4  ;;  %v483_v7 = vld [vmem:[%s648_s1 + $0x48] ss:$12 sps:$4 sm:$0xff]   ;;  %v484_v9 = vld [vmem:[%s648_s1 + $0x30] ss:$12 sps:$4 sm:$0xff]  }
   0x4   :  { %419 = vmatprep.subr.bf16.mxu0 %v503_v0  ;;  %439 = vmatprep.subr.bf16.mxu1 %v503_v0  ;;  %v490_v10 = vld [vmem:[%s648_s1 + $0x64] ss:$12 sps:$4 sm:$0xff]   ;;  %v491_v12 = vld [vmem:[%s648_s1 + $0x4c] ss:$12 sps:$4 sm:$0xff]   ;;  %v492_v17 = vld [vmem:[%s648_s1 + $0x34] ss:$12 sps:$4 sm:$0xff]  }
   0x5   :  { %v485_v11 = vld [vmem:[%s648_s1 + $0x18] ss:$12 sps:$4 sm:$0xff]   ;;  %v486_v13 = vld [vmem:[%s648_s1] ss:$12 sps:$4 sm:$0xff]   ;;  %v493_v18 = vld [vmem:[%s648_s1 + $0x1c] ss:$12 sps:$4 sm:$0xff]  }
   0x6   :  { %v15_v14 = vld [vmem:[%s649_s0] sm:$0xff]  ;;  %v16_v15 = vld [vmem:[%s649_s0 + $0x8] sm:$0xff]  ;;  %v495_v20 = vld [vmem:[%s648_s1 + $0xb0] ss:$12 sps:$4 sm:$0xff]  }
   0x7   :  { %420 = vmatpush3.bf16.msra.mxu0 %v480_v2  ;;  %440 = vmatpush3.bf16.msra.mxu1 %v488_v6  ;;  %v17_v16 = vpack.c.bf16 %v16_v15, %v15_v14  ;;  %v494_v19 = vld [vmem:[%s648_s1 + $0x4] ss:$12 sps:$4 sm:$0xff]   ;;  %v497_v22 = vld [vmem:[%s648_s1 + $0x80] ss:$12 sps:$4 sm:$0xff]   ;;  %v498_v23 = vld [vmem:[%s648_s1 + $0x68] ss:$12 sps:$4 sm:$0xff]  }
   0x8   :  { %421 = vmatprep.subr.bf16.mxu0 %v503_v0  ;;  %441 = vmatprep.subr.bf16.mxu1 %v503_v0  ;;  %v496_v21 = vld [vmem:[%s648_s1 + $0x98] ss:$12 sps:$4 sm:$0xff]   ;;  %v499_v24 = vld [vmem:[%s648_s1 + $0x50] ss:$12 sps:$4 sm:$0xff]   ;;  %v363_v25 = vld [vmem:[%s650_s2] ss:$0 sm:$0xff] }
   0x9   :  { %v500_v35 = vld [vmem:[%s648_s1 + $0x38] ss:$12 sps:$4 sm:$0xff]   ;;  %v501_v36 = vld [vmem:[%s648_s1 + $0x20] ss:$12 sps:$4 sm:$0xff]   ;;  %v502_v37 = vld [vmem:[%s648_s1 + $0x8] ss:$12 sps:$4 sm:$0xff]  }
   0xa   :  { %v372_v38 = vld [vmem:[%s650_s2 + $0x1] ss:$0 sm:$0xff]  ;;  %v389_v48 = vld [vmem:[%s650_s2 + $0x2] ss:$0 sm:$0xff] }
   0xb   :  { %422 = vmatpush3.bf16.msra.mxu0 %v481_v3  ;;  %442 = vmatpush3.bf16.msra.mxu1 %v489_v8 }
   0xc   :  { %423 = vmatprep.subr.bf16.mxu0 %v503_v0  ;;  %443 = vmatprep.subr.bf16.mxu1 %v503_v0 }
   0xf   :  { %424 = vmatpush3.bf16.msra.mxu0 %v482_v5  ;;  %444 = vmatpush3.bf16.msra.mxu1 %v490_v10 }
  0x10   :  { %425 = vmatprep.subr.bf16.mxu0 %v503_v0  ;;  %445 = vmatprep.subr.bf16.mxu1 %v503_v0 }
  0x13   :  { %426 = vmatpush3.bf16.msra.mxu0 %v483_v7  ;;  %446 = vmatpush3.bf16.msra.mxu1 %v491_v12 }
  0x14   :  { %427 = vmatprep.subr.bf16.mxu0 %v503_v0  ;;  %447 = vmatprep.subr.bf16.mxu1 %v503_v0 }
  0x17   :  { %428 = vmatpush3.bf16.msra.mxu0 %v484_v9  ;;  %448 = vmatpush3.bf16.msra.mxu1 %v492_v17 }
  0x18   :  { %429 = vmatprep.subr.bf16.mxu0 %v503_v0  ;;  %449 = vmatprep.subr.bf16.mxu1 %v503_v0 }
  0x1b   :  { %430 = vmatpush3.bf16.msra.mxu0 %v485_v11  ;;  %450 = vmatpush3.bf16.msra.mxu1 %v493_v18 }
  0x1c   :  { %431 = vmatprep.subr.bf16.mxu0 %v503_v0  ;;  %451 = vmatprep.subr.bf16.mxu1 %v503_v0 }
  0x1f   :  { %432 = vmatpush3.bf16.msra.mxu0 %v486_v13  ;;  %452 = vmatpush3.bf16.msra.mxu1 %v494_v19 }
  0x20   :  { %457 = vmatprep.subr.bf16.mxu0 %v503_v0 }
  0x22   :  { %434 = vmatmul.mubr.bf16.vlgmr.msra.gmra.mxu0 %v17_v16 }
  0x23   :  { %473 = vmatprep.mubr.msk.bf16.mxu0 %vm504_vm0, %v503_v0  ;;  %458 = vmatpush3.bf16.msra.mxu0 %v495_v20 }
  0x24   :  { %459 = vmatprep.subr.bf16.mxu0 %v503_v0 }
  0x27   :  { %460 = vmatpush3.bf16.msra.mxu0 %v496_v21 }
  0x28   :  { %461 = vmatprep.subr.bf16.mxu0 %v503_v0 }
  0x2b   :  { %462 = vmatpush3.bf16.msra.mxu0 %v497_v22 }
  0x2c   :  { %463 = vmatprep.subr.bf16.mxu0 %v503_v0 }
  0x2f   :  { %464 = vmatpush3.bf16.msra.mxu0 %v498_v23 }
  0x30   :  { %465 = vmatprep.subr.bf16.mxu0 %v503_v0 }
  0x33   :  { %466 = vmatpush3.bf16.msra.mxu0 %v499_v24 }
  0x34   :  { %467 = vmatprep.subr.bf16.mxu0 %v503_v0 }
  0x37   :  { %468 = vmatpush3.bf16.msra.mxu0 %v500_v35 }
  0x38   :  { %469 = vmatprep.subr.bf16.mxu0 %v503_v0 }
  0x3b   :  { %470 = vmatpush3.bf16.msra.mxu0 %v501_v36 }
  0x3c   :  { %471 = vmatprep.subr.bf16.mxu0 %v503_v0 }
  0x3f   :  { %472 = vmatpush3.bf16.msra.mxu0 %v502_v37 }
  0xe2   :  { %v155_v26 = vpop.f32.mrf.mxu0 }
  0xe3   :  { %v156_v28 = vadd.f32 %v363_v25, %v155_v26 }
  0xe4   :  { %v435_v27 = vpop.f32.mrf.mxu0 }
  0xe5   :  { %v162_v32 = vmax.f32 %v156_v28, 0.0 }
  0xe6   :  { %v158_v29 = vpop.f32.mrf.mxu0 }
  0xe7   :  { %v159_v30 = vadd.f32 %v363_v25, %v158_v29 }
  0xe8   :  { %v436_v31 = vpop.f32.mrf.mxu0 }
  0xe9   :  { %v163_v33 = vmax.f32 %v159_v30, 0.0 }
  0xeb   :  { %v164_v34 = vpack.c.bf16 %v163_v33, %v162_v32 }
  0xed   :  { %454 = vmatmul.mubr.bf16.vlgmr.msra.gmra.mxu1 %v164_v34 }
 0x1ad   :  { %v251_v39 = vpop.f32.mrf.mxu1 }
 0x1ae   :  { %v252_v41 = vadd.f32 %v372_v38, %v251_v39 }
 0x1af   :  { %v455_v40 = vpop.f32.mrf.mxu1 }
 0x1b0   :  { %v258_v45 = vmax.f32 %v252_v41, 0.0 }
 0x1b1   :  { %v254_v42 = vpop.f32.mrf.mxu1 }
 0x1b2   :  { %v255_v43 = vadd.f32 %v372_v38, %v254_v42 }
 0x1b3   :  { %v456_v44 = vpop.f32.mrf.mxu1 }
 0x1b4   :  { %v259_v46 = vmax.f32 %v255_v43, 0.0 }
 0x1b6   :  { %v260_v47 = vpack.c.bf16 %v259_v46, %v258_v45 }
 0x1b8   :  { %474 = vmatmul.mubr.bf16.vlgmr.msra.gmra.mxu0 %v260_v47 }
 0x278   :  { %v343_v49 = vpop.f32.mrf.mxu0 }
 0x279   :  { %v354_v50 = vadd.f32 %v389_v48, %v343_v49 }
 0x27a   :  { %v475_v51 = vpop.f32.mrf.mxu0 }
 0x27b   :  { %357 = vst.msk [vmem:[%s651_s3] sm:$0xff] %vm356_vm1, %v354_v50 }
 0x27c   :  { %v346_v52 = vpop.f32.mrf.mxu0 }
 0x27d   :  { %v355_v53 = vadd.f32 %v389_v48, %v346_v52 }
 0x27e   :  { %v476_v54 = vpop.f32.mrf.mxu0 }
 0x27f   :  { %358 = vst.msk [vmem:[%s651_s3 + $0x8] sm:$0xff] %vm356_vm1, %v355_v53 }

</bundles_post_ra>
